<compile_context>
chip_gen: v5e
topology: v5e:2x2
jax: 0.10.0
libtpu: 0.0.40
codegen_flags: <defaults>
</compile_context>

<pallas_src>
import functools

import jax
import jax.numpy as jnp
from jax import lax
from jax.experimental import pallas as pl
from jax.experimental.pallas import tpu as pltpu

_EPS = 1e-5  # PyTorch GroupNorm default eps
_INV_SQRT2 = 0.7071067811865476


def _gelu_exact(x):
    # PyTorch F.gelu default is the exact (erf-based) variant.
    return 0.5 * x * (1.0 + lax.erf(x * jnp.float32(_INV_SQRT2)))


def _group_norm1(y, gamma, beta):
    # GroupNorm(num_groups=1) over all (C, H*W) of one sample, biased variance,
    # per-channel affine. Single fused pass: var = E[y^2] - mean^2.
    count = jnp.float32(y.shape[0] * y.shape[1])
    s = jnp.sum(y)
    ss = jnp.sum(y * y)
    mean = s / count
    var = ss / count - mean * mean
    inv = lax.rsqrt(var + jnp.float32(_EPS))
    return (y - mean) * inv * gamma + beta


def _double_conv_kernel(x_ref, w1_ref, g1w_ref, g1b_ref,
                        w2_ref, g2w_ref, g2b_ref,
                        out_ref, *, H, W, residual):
    HW = H * W
    x = x_ref[0]                                              # (Cin, H*W) f32

    # Column-index masks for the dx = -1 / +1 taps (row-wrap suppression).
    wcol = lax.broadcasted_iota(jnp.int32, (1, HW), 1) % W
    not_left = wcol >= 1          # valid output columns for dx = -1
    not_right = wcol <= (W - 2)   # valid output columns for dx = +1

    def im2col(v):
        # v: (C, H*W) -> (9*C, H*W); row order (ky, kx, c) matches HWIO weights.
        C = v.shape[0]
        zpad = jnp.zeros((C, W + 1), jnp.float32)
        vext = jnp.concatenate([zpad, v, zpad], axis=1)       # (C, H*W + 2W + 2)
        taps = []
        for ky in range(3):
            for kx in range(3):
                off = (W + 1) + (ky - 1) * W + (kx - 1)       # static lane offset
                t = vext[:, off:off + HW]
                if kx == 0:
                    t = jnp.where(not_left, t, 0.0)
                elif kx == 2:
                    t = jnp.where(not_right, t, 0.0)
                taps.append(t)
        return jnp.concatenate(taps, axis=0)                  # (9*C, H*W)

    # ---- conv1 (3x3, pad=1, no bias) as one MXU matmul ----
    a1 = im2col(x)                                            # (9*Cin, H*W)
    y = jnp.dot(w1_ref[...], a1, preferred_element_type=jnp.float32)  # (Cmid, H*W)
    # ---- GroupNorm(1, Cmid) + GELU ----
    y = _group_norm1(y, g1w_ref[...], g1b_ref[...])
    y = _gelu_exact(y)

    # ---- conv2 (3x3, pad=1, no bias) ----
    a2 = im2col(y)                                            # (9*Cmid, H*W)
    z = jnp.dot(w2_ref[...], a2, preferred_element_type=jnp.float32)  # (Cout, H*W)
    # ---- GroupNorm(1, Cout) ----
    z = _group_norm1(z, g2w_ref[...], g2b_ref[...])

    if residual:
        # requires Cin == Cout
        z = _gelu_exact(x + z)

    out_ref[0] = z.astype(out_ref.dtype)


def double_conv2d(x_nchw, params, residual=False):
    """x_nchw: (N, Cin, H, W) float32. Returns (N, Cout, H, W)."""
    w1, g1w, g1b, w2, g2w, g2b = params
    x = x_nchw.astype(jnp.float32)
    N, Cin, H, W = x.shape
    Cmid = w1.shape[-1]
    Cout = w2.shape[-1]
    HW = H * W

    # Free views / tiny one-time weight reshapes (no padded/transposed HBM copies of x).
    x_flat = x.reshape(N, Cin, HW)
    w1m = w1.reshape(9 * Cin, Cmid).T.astype(jnp.float32)     # (Cmid, 9*Cin)
    w2m = w2.reshape(9 * Cmid, Cout).T.astype(jnp.float32)    # (Cout, 9*Cmid)
    g1w_c = g1w.reshape(-1, 1).astype(jnp.float32)            # (Cmid, 1)
    g1b_c = g1b.reshape(-1, 1).astype(jnp.float32)
    g2w_c = g2w.reshape(-1, 1).astype(jnp.float32)            # (Cout, 1)
    g2b_c = g2b.reshape(-1, 1).astype(jnp.float32)

    kernel = functools.partial(_double_conv_kernel, H=H, W=W, residual=residual)

    out = pl.pallas_call(
        kernel,
        out_shape=jax.ShapeDtypeStruct((N, Cout, HW), jnp.float32),
        grid_spec=pltpu.PrefetchScalarGridSpec(
            num_scalar_prefetch=0,
            grid=(N,),
            in_specs=[
                pl.BlockSpec((1, Cin, HW), lambda n: (n, 0, 0)),
                pl.BlockSpec((Cmid, 9 * Cin), lambda n: (0, 0)),
                pl.BlockSpec((Cmid, 1), lambda n: (0, 0)),
                pl.BlockSpec((Cmid, 1), lambda n: (0, 0)),
                pl.BlockSpec((Cout, 9 * Cmid), lambda n: (0, 0)),
                pl.BlockSpec((Cout, 1), lambda n: (0, 0)),
                pl.BlockSpec((Cout, 1), lambda n: (0, 0)),
            ],
            out_specs=pl.BlockSpec((1, Cout, HW), lambda n: (n, 0, 0)),
        ),
        compiler_params=pltpu.CompilerParams(
            dimension_semantics=("parallel",)),
    )(x_flat, w1m, g1w_c, g1b_c, w2m, g2w_c, g2b_c)

    return out.reshape(N, Cout, H, W)


# ----------------------- pure-JAX reference -----------------------
def _ref_double_conv(x_nchw, params, residual=False):
    w1, g1w, g1b, w2, g2w, g2b = params
    x = jnp.transpose(x_nchw, (0, 2, 3, 1)).astype(jnp.float32)

    def conv(a, w):
        return lax.conv_general_dilated(
            a, w, window_strides=(1, 1), padding="SAME",
            dimension_numbers=("NHWC", "HWIO", "NHWC"))

    def gn(a, g, b):
        mean = jnp.mean(a, axis=(1, 2, 3), keepdims=True)
        var = jnp.mean((a - mean) ** 2, axis=(1, 2, 3), keepdims=True)
        return (a - mean) / jnp.sqrt(var + _EPS) * g + b

    y = conv(x, w1)
    y = gn(y, g1w, g1b)
    y = jax.nn.gelu(y, approximate=False)
    z = conv(y, w2)
    z = gn(z, g2w, g2b)
    if residual:
        z = jax.nn.gelu(x + z, approximate=False)
    return jnp.transpose(z, (0, 3, 1, 2))


def _make_params(key, cin, cmid, cout):
    k1, k2, k3, k4, k5, k6 = jax.random.split(key, 6)
    scale1 = 1.0 / jnp.sqrt(9.0 * cin)
    scale2 = 1.0 / jnp.sqrt(9.0 * cmid)
    w1 = jax.random.uniform(k1, (3, 3, cin, cmid), jnp.float32, -scale1, scale1)
    w2 = jax.random.uniform(k2, (3, 3, cmid, cout), jnp.float32, -scale2, scale2)
    g1w = 1.0 + 0.1 * jax.random.normal(k3, (cmid,), jnp.float32)
    g1b = 0.1 * jax.random.normal(k4, (cmid,), jnp.float32)
    g2w = 1.0 + 0.1 * jax.random.normal(k5, (cout,), jnp.float32)
    g2b = 0.1 * jax.random.normal(k6, (cout,), jnp.float32)
    return (w1, g1w, g1b, w2, g2w, g2b)


if __name__ == "__main__":
    key = jax.random.PRNGKey(0)
    kx, kp, kx2, kp2 = jax.random.split(key, 4)

    # Case 1: non-residual, in_ch=4 -> out_ch=8 (mid_ch=out_ch)
    N, Cin, Cout, H, W = 2, 4, 8, 16, 16
    x = jax.random.normal(kx, (N, Cin, H, W), jnp.float32)
    params = _make_params(kp, Cin, Cout, Cout)
    out = jax.block_until_ready(double_conv2d(x, params, residual=False))
    ref = _ref_double_conv(x, params, residual=False)
    err = float(jnp.max(jnp.abs(out - ref)))
    assert out.shape == (N, Cout, H, W)
    assert err < 1e-3, f"non-residual mismatch: {err}"

    # Case 2: residual, in_ch == out_ch == 8
    C = 8
    x2 = jax.random.normal(kx2, (N, C, H, W), jnp.float32)
    params2 = _make_params(kp2, C, C, C)
    out2 = jax.block_until_ready(double_conv2d(x2, params2, residual=True))
    ref2 = _ref_double_conv(x2, params2, residual=True)
    err2 = float(jnp.max(jnp.abs(out2 - ref2)))
    assert out2.shape == (N, C, H, W)
    assert err2 < 1e-3, f"residual mismatch: {err2}"

    print("KERNEL_OK")
</pallas_src>

<mosaic_0001>
module attributes {stable_mosaic.version = 11 : i64} {
  func.func @_double_conv_kernel(%arg0: i32, %arg1: memref<1x4x256xf32, #tpu.memory_space<vmem>>, %arg2: memref<8x36xf32, #tpu.memory_space<vmem>>, %arg3: memref<8x1xf32, #tpu.memory_space<vmem>>, %arg4: memref<8x1xf32, #tpu.memory_space<vmem>>, %arg5: memref<8x72xf32, #tpu.memory_space<vmem>>, %arg6: memref<8x1xf32, #tpu.memory_space<vmem>>, %arg7: memref<8x1xf32, #tpu.memory_space<vmem>>, %arg8: memref<1x8x256xf32, #tpu.memory_space<vmem>>) attributes {dimension_semantics = [#tpu.dimension_semantics<parallel>], iteration_bounds = array<i64: 2>, scalar_prefetch = 0 : i64, scratch_operands = 0 : i64, tpu.core_type = #tpu.core_type<tc>, window_params = [{transform_indices = @transform_0, window_bounds = array<i64: 1, 4, 256>}, {pipeline_mode = #tpu.pipeline_mode<synchronous>, transform_indices = @transform_1, window_bounds = array<i64: 8, 36>}, {pipeline_mode = #tpu.pipeline_mode<synchronous>, transform_indices = @transform_2, window_bounds = array<i64: 8, 1>}, {pipeline_mode = #tpu.pipeline_mode<synchronous>, transform_indices = @transform_3, window_bounds = array<i64: 8, 1>}, {pipeline_mode = #tpu.pipeline_mode<synchronous>, transform_indices = @transform_4, window_bounds = array<i64: 8, 72>}, {pipeline_mode = #tpu.pipeline_mode<synchronous>, transform_indices = @transform_5, window_bounds = array<i64: 8, 1>}, {pipeline_mode = #tpu.pipeline_mode<synchronous>, transform_indices = @transform_6, window_bounds = array<i64: 8, 1>}, {transform_indices = @transform_7, window_bounds = array<i64: 1, 8, 256>}]} {
    %c0 = arith.constant 0 : index
    %c0_0 = arith.constant 0 : index
    %c0_1 = arith.constant 0 : index
    %0 = vector.load %arg1[%c0, %c0_0, %c0_1] : memref<1x4x256xf32, #tpu.memory_space<vmem>>, vector<1x4x256xf32>
    %1 = vector.shape_cast %0 : vector<1x4x256xf32> to vector<4x256xf32>
    %2 = tpu.iota {dimensions = array<i32: 1>} : vector<1x256xi32>
    %c16_i32 = arith.constant 16 : i32
    %c0_i32 = arith.constant 0 : i32
    %3 = arith.cmpi eq, %c16_i32, %c0_i32 : i32
    %c1_i32 = arith.constant 1 : i32
    %4 = arith.select %3, %c1_i32, %c16_i32 : i32
    %5 = vector.broadcast %4 : i32 to vector<1x256xi32>
    %6 = arith.remsi %2, %5 : vector<1x256xi32>
    %c0_i32_2 = arith.constant 0 : i32
    %7 = vector.broadcast %c0_i32_2 : i32 to vector<1x256xi32>
    %8 = arith.cmpi ne, %6, %7 : vector<1x256xi32>
    %c0_i32_3 = arith.constant 0 : i32
    %9 = vector.broadcast %c0_i32_3 : i32 to vector<1x256xi32>
    %10 = arith.cmpi slt, %6, %9 : vector<1x256xi32>
    %c0_i32_4 = arith.constant 0 : i32
    %11 = arith.cmpi slt, %4, %c0_i32_4 : i32
    %12 = vector.broadcast %11 : i1 to vector<1x256xi1>
    %13 = vector.broadcast %12 : vector<1x256xi1> to vector<1x256xi1>
    %14 = arith.xori %10, %13 : vector<1x256xi1>
    %15 = arith.andi %14, %8 : vector<1x256xi1>
    %16 = vector.broadcast %4 : i32 to vector<1x256xi32>
    %17 = arith.addi %6, %16 : vector<1x256xi32>
    %18 = arith.select %15, %17, %6 : vector<1x256xi1>, vector<1x256xi32>
    %c1_i32_5 = arith.constant 1 : i32
    %19 = vector.broadcast %c1_i32_5 : i32 to vector<1x256xi32>
    %20 = arith.cmpi sge, %18, %19 : vector<1x256xi32>
    %c14_i32 = arith.constant 14 : i32
    %21 = vector.broadcast %c14_i32 : i32 to vector<1x256xi32>
    %22 = arith.cmpi sle, %18, %21 : vector<1x256xi32>
    %cst = arith.constant 0.000000e+00 : f32
    %23 = vector.broadcast %cst : f32 to vector<4x17xf32>
    %24 = tpu.concatenate %23, %1, %23 in 1 : vector<4x17xf32>, vector<4x256xf32>, vector<4x17xf32> -> vector<4x290xf32>
    %25 = vector.extract_strided_slice %24 {offsets = [0, 0], sizes = [4, 256], strides = [1, 1]} : vector<4x290xf32> to vector<4x256xf32>
    %cst_6 = arith.constant 0.000000e+00 : f32
    %26 = vector.shape_cast %20 : vector<1x256xi1> to vector<1x256xi1>
    %27 = vector.broadcast %26 : vector<1x256xi1> to vector<4x256xi1>
    %28 = vector.broadcast %cst_6 : f32 to vector<4x256xf32>
    %29 = arith.select %27, %25, %28 : vector<4x256xi1>, vector<4x256xf32>
    %30 = vector.extract_strided_slice %24 {offsets = [0, 1], sizes = [4, 256], strides = [1, 1]} : vector<4x290xf32> to vector<4x256xf32>
    %31 = vector.extract_strided_slice %24 {offsets = [0, 2], sizes = [4, 256], strides = [1, 1]} : vector<4x290xf32> to vector<4x256xf32>
    %cst_7 = arith.constant 0.000000e+00 : f32
    %32 = vector.shape_cast %22 : vector<1x256xi1> to vector<1x256xi1>
    %33 = vector.broadcast %32 : vector<1x256xi1> to vector<4x256xi1>
    %34 = vector.broadcast %cst_7 : f32 to vector<4x256xf32>
    %35 = arith.select %33, %31, %34 : vector<4x256xi1>, vector<4x256xf32>
    %36 = vector.extract_strided_slice %24 {offsets = [0, 16], sizes = [4, 256], strides = [1, 1]} : vector<4x290xf32> to vector<4x256xf32>
    %cst_8 = arith.constant 0.000000e+00 : f32
    %37 = vector.shape_cast %20 : vector<1x256xi1> to vector<1x256xi1>
    %38 = vector.broadcast %37 : vector<1x256xi1> to vector<4x256xi1>
    %39 = vector.broadcast %cst_8 : f32 to vector<4x256xf32>
    %40 = arith.select %38, %36, %39 : vector<4x256xi1>, vector<4x256xf32>
    %41 = vector.extract_strided_slice %24 {offsets = [0, 17], sizes = [4, 256], strides = [1, 1]} : vector<4x290xf32> to vector<4x256xf32>
    %42 = vector.extract_strided_slice %24 {offsets = [0, 18], sizes = [4, 256], strides = [1, 1]} : vector<4x290xf32> to vector<4x256xf32>
    %cst_9 = arith.constant 0.000000e+00 : f32
    %43 = vector.shape_cast %22 : vector<1x256xi1> to vector<1x256xi1>
    %44 = vector.broadcast %43 : vector<1x256xi1> to vector<4x256xi1>
    %45 = vector.broadcast %cst_9 : f32 to vector<4x256xf32>
    %46 = arith.select %44, %42, %45 : vector<4x256xi1>, vector<4x256xf32>
    %47 = vector.extract_strided_slice %24 {offsets = [0, 32], sizes = [4, 256], strides = [1, 1]} : vector<4x290xf32> to vector<4x256xf32>
    %cst_10 = arith.constant 0.000000e+00 : f32
    %48 = vector.shape_cast %20 : vector<1x256xi1> to vector<1x256xi1>
    %49 = vector.broadcast %48 : vector<1x256xi1> to vector<4x256xi1>
    %50 = vector.broadcast %cst_10 : f32 to vector<4x256xf32>
    %51 = arith.select %49, %47, %50 : vector<4x256xi1>, vector<4x256xf32>
    %52 = vector.extract_strided_slice %24 {offsets = [0, 33], sizes = [4, 256], strides = [1, 1]} : vector<4x290xf32> to vector<4x256xf32>
    %53 = vector.extract_strided_slice %24 {offsets = [0, 34], sizes = [4, 256], strides = [1, 1]} : vector<4x290xf32> to vector<4x256xf32>
    %cst_11 = arith.constant 0.000000e+00 : f32
    %54 = vector.shape_cast %22 : vector<1x256xi1> to vector<1x256xi1>
    %55 = vector.broadcast %54 : vector<1x256xi1> to vector<4x256xi1>
    %56 = vector.broadcast %cst_11 : f32 to vector<4x256xf32>
    %57 = arith.select %55, %53, %56 : vector<4x256xi1>, vector<4x256xf32>
    %58 = tpu.concatenate %29, %30, %35, %40, %41, %46, %51, %52, %57 in 0 : vector<4x256xf32>, vector<4x256xf32>, vector<4x256xf32>, vector<4x256xf32>, vector<4x256xf32>, vector<4x256xf32>, vector<4x256xf32>, vector<4x256xf32>, vector<4x256xf32> -> vector<36x256xf32>
    %c0_12 = arith.constant 0 : index
    %c0_13 = arith.constant 0 : index
    %59 = vector.load %arg2[%c0_12, %c0_13] : memref<8x36xf32, #tpu.memory_space<vmem>>, vector<8x36xf32>
    %cst_14 = arith.constant dense<0.000000e+00> : vector<8x256xf32>
    %60 = tpu.matmul %59, %58, %cst_14 {dimension_numbers = #tpu.dot_dimension_numbers<[1], [0], [0], [1], [0, 0, 1, 1], [], []>} : vector<8x36xf32>, vector<36x256xf32>, vector<8x256xf32> -> vector<8x256xf32>
    %c0_15 = arith.constant 0 : index
    %c0_16 = arith.constant 0 : index
    %61 = vector.load %arg3[%c0_15, %c0_16] : memref<8x1xf32, #tpu.memory_space<vmem>>, vector<8x1xf32>
    %c0_17 = arith.constant 0 : index
    %c0_18 = arith.constant 0 : index
    %62 = vector.load %arg4[%c0_17, %c0_18] : memref<8x1xf32, #tpu.memory_space<vmem>>, vector<8x1xf32>
    %63 = vector.shape_cast %60 : vector<8x256xf32> to vector<1x8x256xf32>
    %cst_19 = arith.constant dense<0.000000e+00> : vector<1xf32>
    %64 = vector.multi_reduction <add>, %63, %cst_19 [1, 2] : vector<1x8x256xf32> to vector<1xf32>
    %65 = vector.shape_cast %64 : vector<1xf32> to vector<1x1x1xf32>
    %66 = vector.extract %65[0, 0, 0] : f32 from vector<1x1x1xf32>
    %67 = arith.mulf %60, %60 : vector<8x256xf32>
    %68 = vector.shape_cast %67 : vector<8x256xf32> to vector<1x8x256xf32>
    %cst_20 = arith.constant dense<0.000000e+00> : vector<1xf32>
    %69 = vector.multi_reduction <add>, %68, %cst_20 [1, 2] : vector<1x8x256xf32> to vector<1xf32>
    %70 = vector.shape_cast %69 : vector<1xf32> to vector<1x1x1xf32>
    %71 = vector.extract %70[0, 0, 0] : f32 from vector<1x1x1xf32>
    %cst_21 = arith.constant 2.048000e+03 : f32
    %72 = arith.divf %66, %cst_21 : f32
    %cst_22 = arith.constant 2.048000e+03 : f32
    %73 = arith.divf %71, %cst_22 : f32
    %74 = arith.mulf %72, %72 : f32
    %75 = arith.subf %73, %74 : f32
    %cst_23 = arith.constant 9.99999974E-6 : f32
    %76 = arith.addf %75, %cst_23 : f32
    %77 = math.rsqrt %76 : f32
    %78 = vector.broadcast %72 : f32 to vector<8x256xf32>
    %79 = arith.subf %60, %78 : vector<8x256xf32>
    %80 = vector.broadcast %77 : f32 to vector<8x256xf32>
    %81 = arith.mulf %79, %80 : vector<8x256xf32>
    %82 = vector.broadcast %61 : vector<8x1xf32> to vector<8x256xf32>
    %83 = arith.mulf %81, %82 : vector<8x256xf32>
    %84 = vector.broadcast %62 : vector<8x1xf32> to vector<8x256xf32>
    %85 = arith.addf %83, %84 : vector<8x256xf32>
    %cst_24 = arith.constant 5.000000e-01 : f32
    %86 = vector.broadcast %cst_24 : f32 to vector<8x256xf32>
    %87 = arith.mulf %86, %85 : vector<8x256xf32>
    %cst_25 = arith.constant 0.707106769 : f32
    %88 = vector.broadcast %cst_25 : f32 to vector<8x256xf32>
    %89 = arith.mulf %85, %88 : vector<8x256xf32>
    %90 = math.erf %89 : vector<8x256xf32>
    %cst_26 = arith.constant 1.000000e+00 : f32
    %91 = vector.broadcast %cst_26 : f32 to vector<8x256xf32>
    %92 = arith.addf %91, %90 : vector<8x256xf32>
    %93 = arith.mulf %87, %92 : vector<8x256xf32>
    %cst_27 = arith.constant 0.000000e+00 : f32
    %94 = vector.broadcast %cst_27 : f32 to vector<8x17xf32>
    %95 = tpu.concatenate %94, %93, %94 in 1 : vector<8x17xf32>, vector<8x256xf32>, vector<8x17xf32> -> vector<8x290xf32>
    %96 = vector.extract_strided_slice %95 {offsets = [0, 0], sizes = [8, 256], strides = [1, 1]} : vector<8x290xf32> to vector<8x256xf32>
    %cst_28 = arith.constant 0.000000e+00 : f32
    %97 = vector.shape_cast %20 : vector<1x256xi1> to vector<1x256xi1>
    %98 = vector.broadcast %97 : vector<1x256xi1> to vector<8x256xi1>
    %99 = vector.broadcast %cst_28 : f32 to vector<8x256xf32>
    %100 = arith.select %98, %96, %99 : vector<8x256xi1>, vector<8x256xf32>
    %101 = vector.extract_strided_slice %95 {offsets = [0, 1], sizes = [8, 256], strides = [1, 1]} : vector<8x290xf32> to vector<8x256xf32>
    %102 = vector.extract_strided_slice %95 {offsets = [0, 2], sizes = [8, 256], strides = [1, 1]} : vector<8x290xf32> to vector<8x256xf32>
    %cst_29 = arith.constant 0.000000e+00 : f32
    %103 = vector.shape_cast %22 : vector<1x256xi1> to vector<1x256xi1>
    %104 = vector.broadcast %103 : vector<1x256xi1> to vector<8x256xi1>
    %105 = vector.broadcast %cst_29 : f32 to vector<8x256xf32>
    %106 = arith.select %104, %102, %105 : vector<8x256xi1>, vector<8x256xf32>
    %107 = vector.extract_strided_slice %95 {offsets = [0, 16], sizes = [8, 256], strides = [1, 1]} : vector<8x290xf32> to vector<8x256xf32>
    %cst_30 = arith.constant 0.000000e+00 : f32
    %108 = vector.shape_cast %20 : vector<1x256xi1> to vector<1x256xi1>
    %109 = vector.broadcast %108 : vector<1x256xi1> to vector<8x256xi1>
    %110 = vector.broadcast %cst_30 : f32 to vector<8x256xf32>
    %111 = arith.select %109, %107, %110 : vector<8x256xi1>, vector<8x256xf32>
    %112 = vector.extract_strided_slice %95 {offsets = [0, 17], sizes = [8, 256], strides = [1, 1]} : vector<8x290xf32> to vector<8x256xf32>
    %113 = vector.extract_strided_slice %95 {offsets = [0, 18], sizes = [8, 256], strides = [1, 1]} : vector<8x290xf32> to vector<8x256xf32>
    %cst_31 = arith.constant 0.000000e+00 : f32
    %114 = vector.shape_cast %22 : vector<1x256xi1> to vector<1x256xi1>
    %115 = vector.broadcast %114 : vector<1x256xi1> to vector<8x256xi1>
    %116 = vector.broadcast %cst_31 : f32 to vector<8x256xf32>
    %117 = arith.select %115, %113, %116 : vector<8x256xi1>, vector<8x256xf32>
    %118 = vector.extract_strided_slice %95 {offsets = [0, 32], sizes = [8, 256], strides = [1, 1]} : vector<8x290xf32> to vector<8x256xf32>
    %cst_32 = arith.constant 0.000000e+00 : f32
    %119 = vector.shape_cast %20 : vector<1x256xi1> to vector<1x256xi1>
    %120 = vector.broadcast %119 : vector<1x256xi1> to vector<8x256xi1>
    %121 = vector.broadcast %cst_32 : f32 to vector<8x256xf32>
    %122 = arith.select %120, %118, %121 : vector<8x256xi1>, vector<8x256xf32>
    %123 = vector.extract_strided_slice %95 {offsets = [0, 33], sizes = [8, 256], strides = [1, 1]} : vector<8x290xf32> to vector<8x256xf32>
    %124 = vector.extract_strided_slice %95 {offsets = [0, 34], sizes = [8, 256], strides = [1, 1]} : vector<8x290xf32> to vector<8x256xf32>
    %cst_33 = arith.constant 0.000000e+00 : f32
    %125 = vector.shape_cast %22 : vector<1x256xi1> to vector<1x256xi1>
    %126 = vector.broadcast %125 : vector<1x256xi1> to vector<8x256xi1>
    %127 = vector.broadcast %cst_33 : f32 to vector<8x256xf32>
    %128 = arith.select %126, %124, %127 : vector<8x256xi1>, vector<8x256xf32>
    %129 = tpu.concatenate %100, %101, %106, %111, %112, %117, %122, %123, %128 in 0 : vector<8x256xf32>, vector<8x256xf32>, vector<8x256xf32>, vector<8x256xf32>, vector<8x256xf32>, vector<8x256xf32>, vector<8x256xf32>, vector<8x256xf32>, vector<8x256xf32> -> vector<72x256xf32>
    %c0_34 = arith.constant 0 : index
    %c0_35 = arith.constant 0 : index
    %130 = vector.load %arg5[%c0_34, %c0_35] : memref<8x72xf32, #tpu.memory_space<vmem>>, vector<8x72xf32>
    %cst_36 = arith.constant dense<0.000000e+00> : vector<8x256xf32>
    %131 = tpu.matmul %130, %129, %cst_36 {dimension_numbers = #tpu.dot_dimension_numbers<[1], [0], [0], [1], [0, 0, 1, 1], [], []>} : vector<8x72xf32>, vector<72x256xf32>, vector<8x256xf32> -> vector<8x256xf32>
    %c0_37 = arith.constant 0 : index
    %c0_38 = arith.constant 0 : index
    %132 = vector.load %arg6[%c0_37, %c0_38] : memref<8x1xf32, #tpu.memory_space<vmem>>, vector<8x1xf32>
    %c0_39 = arith.constant 0 : index
    %c0_40 = arith.constant 0 : index
    %133 = vector.load %arg7[%c0_39, %c0_40] : memref<8x1xf32, #tpu.memory_space<vmem>>, vector<8x1xf32>
    %134 = vector.shape_cast %131 : vector<8x256xf32> to vector<1x8x256xf32>
    %cst_41 = arith.constant dense<0.000000e+00> : vector<1xf32>
    %135 = vector.multi_reduction <add>, %134, %cst_41 [1, 2] : vector<1x8x256xf32> to vector<1xf32>
    %136 = vector.shape_cast %135 : vector<1xf32> to vector<1x1x1xf32>
    %137 = vector.extract %136[0, 0, 0] : f32 from vector<1x1x1xf32>
    %138 = arith.mulf %131, %131 : vector<8x256xf32>
    %139 = vector.shape_cast %138 : vector<8x256xf32> to vector<1x8x256xf32>
    %cst_42 = arith.constant dense<0.000000e+00> : vector<1xf32>
    %140 = vector.multi_reduction <add>, %139, %cst_42 [1, 2] : vector<1x8x256xf32> to vector<1xf32>
    %141 = vector.shape_cast %140 : vector<1xf32> to vector<1x1x1xf32>
    %142 = vector.extract %141[0, 0, 0] : f32 from vector<1x1x1xf32>
    %cst_43 = arith.constant 2.048000e+03 : f32
    %143 = arith.divf %137, %cst_43 : f32
    %cst_44 = arith.constant 2.048000e+03 : f32
    %144 = arith.divf %142, %cst_44 : f32
    %145 = arith.mulf %143, %143 : f32
    %146 = arith.subf %144, %145 : f32
    %cst_45 = arith.constant 9.99999974E-6 : f32
    %147 = arith.addf %146, %cst_45 : f32
    %148 = math.rsqrt %147 : f32
    %149 = vector.broadcast %143 : f32 to vector<8x256xf32>
    %150 = arith.subf %131, %149 : vector<8x256xf32>
    %151 = vector.broadcast %148 : f32 to vector<8x256xf32>
    %152 = arith.mulf %150, %151 : vector<8x256xf32>
    %153 = vector.broadcast %132 : vector<8x1xf32> to vector<8x256xf32>
    %154 = arith.mulf %152, %153 : vector<8x256xf32>
    %155 = vector.broadcast %133 : vector<8x1xf32> to vector<8x256xf32>
    %156 = arith.addf %154, %155 : vector<8x256xf32>
    %c0_46 = arith.constant 0 : index
    %c0_47 = arith.constant 0 : index
    %c0_48 = arith.constant 0 : index
    %157 = vector.load %arg8[%c0_46, %c0_47, %c0_48] : memref<1x8x256xf32, #tpu.memory_space<vmem>>, vector<1x8x256xf32>
    %158 = vector.shape_cast %157 : vector<1x8x256xf32> to vector<8x256xf32>
    %159 = vector.shape_cast %156 : vector<8x256xf32> to vector<1x8x256xf32>
    tpu.vector_store %arg8[%c0_46, %c0_47, %c0_48], %159 {strides = array<i32>} : memref<1x8x256xf32, #tpu.memory_space<vmem>>, vector<1x8x256xf32>,
    return
  }
  func.func @transform_0(%arg0: i32) -> (i32, i32, i32) {
    %c0_i32 = arith.constant 0 : i32
    %c0_i32_0 = arith.constant 0 : i32
    %c0_i32_1 = arith.constant 0 : i32
    return %arg0, %c0_i32, %c0_i32_0 : i32, i32, i32
  }
  func.func @transform_1(%arg0: i32) -> (i32, i32) {
    %c0_i32 = arith.constant 0 : i32
    %c0_i32_0 = arith.constant 0 : i32
    %c0_i32_1 = arith.constant 0 : i32
    return %c0_i32, %c0_i32_0 : i32, i32
  }
  func.func @transform_2(%arg0: i32) -> (i32, i32) {
    %c0_i32 = arith.constant 0 : i32
    %c0_i32_0 = arith.constant 0 : i32
    %c0_i32_1 = arith.constant 0 : i32
    return %c0_i32, %c0_i32_0 : i32, i32
  }
  func.func @transform_3(%arg0: i32) -> (i32, i32) {
    %c0_i32 = arith.constant 0 : i32
    %c0_i32_0 = arith.constant 0 : i32
    %c0_i32_1 = arith.constant 0 : i32
    return %c0_i32, %c0_i32_0 : i32, i32
  }
  func.func @transform_4(%arg0: i32) -> (i32, i32) {
    %c0_i32 = arith.constant 0 : i32
    %c0_i32_0 = arith.constant 0 : i32
    %c0_i32_1 = arith.constant 0 : i32
    return %c0_i32, %c0_i32_0 : i32, i32
  }
  func.func @transform_5(%arg0: i32) -> (i32, i32) {
    %c0_i32 = arith.constant 0 : i32
    %c0_i32_0 = arith.constant 0 : i32
    %c0_i32_1 = arith.constant 0 : i32
    return %c0_i32, %c0_i32_0 : i32, i32
  }
  func.func @transform_6(%arg0: i32) -> (i32, i32) {
    %c0_i32 = arith.constant 0 : i32
    %c0_i32_0 = arith.constant 0 : i32
    %c0_i32_1 = arith.constant 0 : i32
    return %c0_i32, %c0_i32_0 : i32, i32
  }
  func.func @transform_7(%arg0: i32) -> (i32, i32, i32) {
    %c0_i32 = arith.constant 0 : i32
    %c0_i32_0 = arith.constant 0 : i32
    %c0_i32_1 = arith.constant 0 : i32
    return %arg0, %c0_i32, %c0_i32_0 : i32, i32, i32
  }
}

</mosaic_0001>

<bundles_post_ra>
// kernel: tpu_custom_call.1
= control target key start
LH: loop header
LB: loop body
LE: loop exit
PB: predicated region body
PF: predicated region fallthrough
CT: control target
= control target key end

     0   :  { %12 = vsyncpa [#allocation3], 0  ;;  %s1582_s0 = inlined_call_operand.vmem [shape: f32[2,4,256], index: 0, kind: input, shape index: {}]   ;;  %s1583_s1 = inlined_call_operand.vmem [shape: f32[8,36], index: 1, kind: input, shape index: {}]   ;;  %s1584_s2 = inlined_call_operand.vmem [shape: f32[8,1], index: 2, kind: input, shape index: {}]   ;;  %s1585_s3 = inlined_call_operand.vmem [shape: f32[8,1], index: 3, kind: input, shape index: {}]   ;;  %s1586_s4 = inlined_call_operand.vmem [shape: f32[8,72], index: 4, kind: input, shape index: {}]   ;;  %s1587_s5 = inlined_call_operand.vmem [shape: f32[8,1], index: 5, kind: input, shape index: {}]   ;;  %s1588_s6 = inlined_call_operand.vmem [shape: f32[8,1], index: 6, kind: input, shape index: {}]   ;;  %s1589_s7 = inlined_call_operand.hbm [shape: f32[2,8,256], index: 7, kind: output, shape index: {}]  }
   0x1   :  { %14 = vsyncpa [#allocation3 + $0x1], 0  ;;  %s1255_s24 = smov 0   ;;  %s1257_s25 = smov 0  }
   0x2   :  { %s1259_s26 = smov 0   ;;  %s1261_s27 = smov 0  }
   0x3 LB: > { %s1276_s28 = sadd.s32 4294967295, %s1202_s27   ;;  %s980_s29 = sadd.s32 4294967294, %s1202_s27   ;;  %s1202_s27 = sphi %s1261_s27, %s1627_s27   ;;  %s1198_s26 = sphi %s1259_s26, %s1626_s26   ;;  %s1194_s25 = sphi %s1257_s25, %s1625_s25   ;;  %s1190_s24 = sphi %s1255_s24, %s1624_s24  }
   0x4   : > { %s1280_s30 = sadd.s32 1, %s1202_s27   ;;  %s179_s8 = sadd.s32 1, %s1198_s26 }
   0x5   : > { %s176_s9 = ssub.s32 %s1202_s27, %s1280_s30  ;;  %p189_p0 = scmp.ne.s32.totalorder %s1198_s26, %s1194_s25 }
   0x6   : > { %p177_p1 = scmp.eq.s32.totalorder %s176_s9, 0  ;;  %p190_p2 = scmp.eq.s32.totalorder %s1276_s28, 1 }
   0x7   : > { %p195_p3 = scmp.ne.s32.totalorder %s1194_s25, %s1190_s24  ;;  %p196_p4 = scmp.eq.s32.totalorder %s980_s29, 1 }
   0x8   : > { %s1291_s10 = scalar_select %p177_p1, %s1198_s26, %s179_s8  }
   0x9   : > { %p1293_p5 = por %p190_p2, %p189_p0  ;;  %p1297_p6 = por %p196_p4, %p195_p3 }
   0xa   : > { %p983_p7 = scmp.ge.s32.totalorder %s1202_s27, 1  ;;  %p240_p8 = scmp.lt.s32.totalorder %s1202_s27, 3 }
   0xc   : > { %p241_p9 = pnand %p983_p7, %p240_p8 }
   0xd   : > { %p272_p10 = scmp.lt.s32.totalorder (!%p241_p9), %s1276_s28, 1  ;;  %s1204_s18 = smov (!%p241_p9), 17  }
   0xe   : > { %244 = sbr.rel (%p241_p9) target bundleno = 1456 (0x5b0), region = 48  ;;  %s1205_s19 = smov (!%p241_p9), 94  }
   0xf   : > { %s1206_s20 = smov (!%p241_p9), 110   ;;  %s1594_s21 = smov (!%p241_p9), 112  }
  0x10   : > { %s1208_s22 = smov (!%p241_p9), 96   ;;  %s1592_s23 = smov (!%p241_p9), 126  }
  0x11   : > { %s1210_s29 = smov (!%p241_p9), 111   ;;  %s1211_s8 = smov (!%p241_p9), 95  }
  0x12   : > { %s1590_s9 = smov (!%p241_p9), 127  }
  0x13   : > { %s273_s13 = scalar_select %p272_p10, %s1276_s28, 1  ;;  %vm317_vm0 = vcmask 138240   ;;  %v278_v15 = vlaneseq  ;;  %vm394_vm1 = vcmask 769024   ;;  %vm449_vm3 = vcmask 1043456   ;;  %v780_v21 = vld [vmem:[%s1586_s4] sm:$0xff] }
  0x14   : > { %vm1600_vm5 = vcmask 900096   ;;  %vm1598_vm6 = vcmask 916480   ;;  %vm381_vm7 = vcmask 785408   ;;  %vm1599_vm10 = vcmask 908288   ;;  %v826_v43 = vld [vmem:[%s1588_s6] sm:$0xff] }
  0x15   : > { %s1012_s14 = sshll.u32 %s273_s13, 3  ;;  %v279_v17 = vand.u32 127, %v278_v15  ;;  %vm1597_vm11 = vcmask 1031168   ;;  %vm444_vm12 = vcmask 777216   ;;  %vm1596_vm13 = vcmask 1039360  }
  0x16   : > { %s276_s17 = scalar_lea.vmem %s1582_s0, %s1012_s14  ;;  %vm459_vm14 = vcmask 293888  }
  0x17   : > { %v277_v0 = vld [vmem:[%s276_s17] sm:$0xff]  ;;  %v280_v19 = vadd.s32 128, %v279_v17  ;;  %v285_v23 = vand.u32 15, %v279_v17 }
  0x18   : > { %310 = vst [vmem:[#allocation1] ss:$2 sm:$0xff] %v277_v0 }
  0x19   : > { %v292_v20 = vand.u32 15, %v280_v19  ;;  %vm1344_vm4 = vcmp.le.s32.totalorder %v285_v23, 14  ;;  %vm1359_vm8 = vcmp.ge.s32.totalorder %v285_v23, 1 }
  0x1b   : > { %vm1340_vm2 = vcmp.le.s32.totalorder %v292_v20, 14  ;;  %vm1364_vm9 = vcmp.ge.s32.totalorder %v292_v20, 1 }
  0x1f   : > { %v311_v1 = vld.sshfl [vmem:[#allocation1] sm:$0xff pattern:$0x75316420]  ;;  %v312_v2 = vld.sshfl [vmem:[#allocation1 + $0x8] sm:$0xff pattern:$0x75316420] }
  0x20   : > { %313 = vrot.lane.b32.xlu0 %v311_v1, %s1204_s18 }
  0x28   : > { %315 = vrot.lane.b32.xlu0 %v312_v2, %s1204_s18 }
  0x92   : > { %v314_v3 = vpop.permute.xlu0 %313 }
  0x93   : > { %v1311_v4 = vsel %vm317_vm0, 0.0, %v314_v3 }
  0x94   : > { %388 = vrot.lane.b32.xlu1 %v1311_v4, %s1205_s19  ;;  %v401_v10 = vrot.slane %v1311_v4, 4  ;;  %v328_v23 = vsel %vm1359_vm8, %v1311_v4, 0.0 }
  0x9a   : > { %v316_v5 = vpop.permute.xlu0 %315 }
  0x9b   : > { %v1316_v6 = vsel %vm317_vm0, %v314_v3, %v316_v5  ;;  %v323_v7 = vsel %vm317_vm0, %v316_v5, 0.0 }
  0x9c   : > { %366 = vrot.lane.b32.xlu0 %v323_v7, %s1206_s20  ;;  %392 = vrot.lane.b32.xlu2 %v323_v7, %s1205_s19  ;;  %v1078_v8 = vpack.i.bf16 %v1316_v6, %v1311_v4  ;;  %v402_v9 = vrot.slane %v1316_v6, 4  ;;  %v403_v12 = vrot.slane %v323_v7, 4  ;;  %v329_v4 = vsel %vm1364_vm9, %v1316_v6, 0.0 }
  0x9d   : > { %390 = vrot.lane.b32.xlu1 %v1316_v6, %s1205_s19  ;;  %v1213_v6 = vmov 0  }
  0x9e   : > { %v1103_v11 = vpack.i.bf16 %v402_v9, %v401_v10  ;;  %1113 = vset.pattern.permute.xlu0 %v1213_v6  ;;  %1129 = vset.pattern.permute.xlu2 %v1213_v6 }
  0xa4   : > { %353 = vrot.lane.b32.xlu0 %v323_v7, %s1594_s21  ;;  %1079 = vrot.lane.b32.xlu2 %v1078_v8, %s1206_s20 }
  0xa5   : > { %1084 = vrot.lane.b32.xlu1 %v1078_v8, %s1208_s22 }
  0xac   : > { %1099 = vrot.lane.b32.xlu0 %v1078_v8, %s1592_s23  ;;  %379 = vrot.lane.b32.xlu2 %v323_v7, %s1208_s22 }
  0xad   : > { %1094 = vrot.lane.b32.xlu1 %v1078_v8, %s1210_s29 }
  0xb4   : > { %1089 = vrot.lane.b32.xlu2 %v1078_v8, %s1594_s21  ;;  %1104 = vrot.lane.b32.xlu0 %v1103_v11, %s1211_s8 }
  0xb5   : > { %442 = vrot.lane.b32.xlu1 %v403_v12, %s1211_s8 }
  0xbc   : > { %425 = vrot.lane.b32.xlu2 %v323_v7, %s1210_s29  ;;  %408 = vrot.lane.b32.xlu0 %v403_v12, %s1590_s9 }
  0xbd   : > { %340 = vrot.lane.b32.xlu1 %v323_v7, %s1592_s23 }
  0xc4   : > { %1109 = vrot.lane.b32.xlu2 %v1103_v11, %s1590_s9 }
  0xf6   : > { %v393_v13 = vpop.permute.xlu2 %392 }
  0xfe   : > { %v1080_v14 = vpop.permute.xlu2 %1079 }
  0xff   : > { %v1082_v33 = vunpack.i.h.bf16 %v1080_v14  ;;  %v1081_v34 = vunpack.i.l.bf16 %v1080_v14 }
 0x101   : > { %v369_v38 = vsel %vm1600_vm5, %v1081_v34, %v1082_v33 }
 0x102   : > { %v373_v46 = vsel %vm1344_vm4, %v369_v38, 0.0 }
 0x103   : > { %v434_v57 = vrot.slane %v373_v46, 4 }
 0x106   : > { %v389_v16 = vpop.permute.xlu1 %388  ;;  %v380_v18 = vpop.permute.xlu2 %379 }
 0x10e   : > { %v367_v22 = vpop.permute.xlu0 %366  ;;  %v1090_v28 = vpop.permute.xlu2 %1089 }
 0x10f   : > { %v391_v24 = vpop.permute.xlu1 %390  ;;  %v1092_v39 = vunpack.i.h.bf16 %v1090_v28  ;;  %v1091_v40 = vunpack.i.l.bf16 %v1090_v28  ;;  %v370_v44 = vsel %vm1600_vm5, %v1082_v33, %v367_v22 }
 0x110   : > { %v395_v26 = vsel %vm394_vm1, %v389_v16, %v391_v24  ;;  %v396_v27 = vsel %vm394_vm1, %v391_v24, %v393_v13  ;;  %v374_v55 = vsel %vm1340_vm2, %v370_v44, 0.0  ;;  %v458_v24 = vld [vmem:[%s1583_s1] sm:$0xff] }
 0x111   : > { %v399_v29 = vsel %vm1344_vm4, %v395_v26, 0.0  ;;  %v400_v30 = vsel %vm1340_vm2, %v396_v27, 0.0  ;;  %v356_v50 = vsel %vm1598_vm6, %v1091_v40, %v1092_v39  ;;  %v435_v9 = vrot.slane %v374_v55, 4 }
 0x112   : > { %987 = vmatpush.msk.msra.mxu0 %vm449_vm3, %v399_v29  ;;  %989 = vmatpush.msk.msra.mxu1 %vm449_vm3, %v400_v30  ;;  %v360_v62 = vsel %vm1359_vm8, %v356_v50, 0.0  ;;  %v1214_v40 = vmov 2048.0  }
 0x113   : > { %v417_v16 = vrot.slane %v360_v62, 4  ;;  %1130 = vrcp.f32 %v1214_v40 }
 0x116   : > { %v354_v31 = vpop.permute.xlu0 %353  ;;  %v426_v35 = vpop.permute.xlu2 %425 }
 0x117   : > { %v1085_v32 = vpop.permute.xlu1 %1084  ;;  %v357_v10 = vsel %vm1598_vm6, %v1092_v39, %v354_v31  ;;  %v509_v39 = vld [vmem:[%s1584_s2] sm:$0xff] }
 0x118   : > { %v1087_v41 = vunpack.i.h.bf16 %v1085_v32  ;;  %v1086_v42 = vunpack.i.l.bf16 %v1085_v32  ;;  %v361_v17 = vsel %vm1364_vm9, %v357_v10, 0.0  ;;  %574 = vperm.xlu0 %1113, %v509_v39  }
 0x119   : > { %v418_v26 = vrot.slane %v361_v17, 4 }
 0x11a   : > { %v382_v49 = vsel %vm381_vm7, %v1086_v42, %v1087_v41  ;;  %v383_v54 = vsel %vm381_vm7, %v1087_v41, %v380_v18  ;;  %v510_v41 = vld [vmem:[%s1585_s3] sm:$0xff]  ;;  %v1131_v42 = vpop.eup %1130 }
 0x11b   : > { %v386_v61 = vsel %vm1359_vm8, %v382_v49, 0.0  ;;  %v387_v1 = vsel %vm1364_vm9, %v383_v54, 0.0  ;;  %v534_v44 = vmul.f32 2048.0, %v1131_v42  ;;  %vm538_vm15 = vweird.f32 %v1131_v42 }
 0x11e   : > { %v1356_v36 = vpop.permute.xlu0 %1099  ;;  %v1110_v53 = vpop.permute.xlu2 %1109 }
 0x11f   : > { %v1095_v37 = vpop.permute.xlu1 %1094  ;;  %v1102_v47 = vunpack.i.h.bf16 %v1356_v36  ;;  %v1101_v48 = vunpack.i.l.bf16 %v1356_v36  ;;  %v1112_v63 = vunpack.i.h.bf16 %v1110_v53  ;;  %v1111_v0 = vunpack.i.l.bf16 %v1110_v53 }
 0x120   : > { %v1097_v51 = vunpack.i.h.bf16 %v1095_v37  ;;  %v1096_v52 = vunpack.i.l.bf16 %v1095_v37  ;;  %581 = vperm.xlu0 %1113, %v510_v41  }
 0x121   : > { %v343_v2 = vsel %vm1597_vm11, %v1101_v48, %v1102_v47  ;;  %v411_v18 = vsel %vm1596_vm13, %v1111_v0, %v1112_v63  ;;  %v535_v48 = vsub.f32 1.0, %v534_v44 }
 0x122   : > { %v428_v7 = vsel %vm1599_vm10, %v1096_v52, %v1097_v51  ;;  %v429_v8 = vsel %vm1599_vm10, %v1097_v51, %v426_v35  ;;  %v347_v13 = vsel %vm1344_vm4, %v343_v2, 0.0  ;;  %v450_v28 = vsel %vm449_vm3, %v328_v23, %v411_v18 }
 0x123   : > { %v454_v14 = vsel %vm449_vm3, %v428_v7, %v434_v57  ;;  %v455_v15 = vsel %vm449_vm3, %v429_v8, %v435_v9  ;;  %v452_v20 = vsel %vm449_vm3, %v347_v13, %v417_v16  ;;  %v536_v54 = vmul.f32 %v1131_v42, %v535_v48 }
 0x126   : > { %v1105_v56 = vpop.permute.xlu0 %1104 }
 0x127   : > { %v443_v58 = vpop.permute.xlu1 %442  ;;  %v1107_v59 = vunpack.i.h.bf16 %v1105_v56  ;;  %v1106_v60 = vunpack.i.l.bf16 %v1105_v56 }
 0x129   : > { %v445_v3 = vsel %vm444_vm12, %v1106_v60, %v1107_v59  ;;  %v446_v5 = vsel %vm444_vm12, %v1107_v59, %v443_v58  ;;  %v537_v59 = vadd.f32 %v1131_v42, %v536_v54 }
 0x12a   : > { %v456_v11 = vsel %vm449_vm3, %v386_v61, %v445_v3  ;;  %v457_v12 = vsel %vm449_vm3, %v387_v1, %v446_v5 }
 0x12b   : > { %481 = vmatpush.msra.mxu0 %v456_v11  ;;  %501 = vmatpush.msra.mxu1 %v457_v12 }
 0x12d   : > { %482 = vmatpush.msra.mxu0 %v454_v14  ;;  %502 = vmatpush.msra.mxu1 %v455_v15 }
 0x12e   : > { %v409_v19 = vpop.permute.xlu0 %408 }
 0x12f   : > { %v341_v22 = vpop.permute.xlu1 %340  ;;  %483 = vmatpush.msra.mxu0 %v452_v20  ;;  %v412_v29 = vsel %vm1596_vm13, %v1112_v63, %v409_v19  ;;  %v539_v63 = vsel %vm538_vm15, %v1131_v42, %v537_v59 }
 0x130   : > { %v344_v27 = vsel %vm1597_vm11, %v1102_v47, %v341_v22  ;;  %v451_v32 = vsel %vm449_vm3, %v329_v4, %v412_v29 }
 0x131   : > { %484 = vmatpush.msra.mxu0 %v450_v28  ;;  %v348_v30 = vsel %vm1340_vm2, %v344_v27, 0.0 }
 0x132   : > { %v453_v31 = vsel %vm449_vm3, %v348_v30, %v418_v26  ;;  %988 = vmatmul.msk.f32.vlgmr.msra.gmra.mxu0 %vm459_vm14, %v458_v24 }
 0x133   : > { %503 = vmatpush.msra.mxu1 %v453_v31 }
 0x135   : > { %504 = vmatpush.msra.mxu1 %v451_v32 }
 0x136   : > { %990 = vmatmul.msk.f32.vlgmr.msra.gmra.mxu1 %vm459_vm14, %v458_v24 }
 0x18a   : > { %v575_v10 = vpop.permute.xlu0 %574 }
 0x192   : > { %v582_v19 = vpop.permute.xlu0 %581 }
 0x1af   : > { %v1415_v33 = vpop.f32.mrf.mxu0 }
 0x1b0   : > { %v521_v34 = vmul.f32 %v1415_v33, %v1415_v33 }
 0x1b3   : > { %v1419_v35 = vpop.f32.mrf.mxu1 }
 0x1b4   : > { %v522_v36 = vmul.f32 %v1419_v35, %v1419_v35  ;;  %v511_v37 = vadd.f32 %v1419_v35, %v1415_v33 }
 0x1b6   : > { %512 = vadd.xlane.f32.xlu1 %v511_v37  ;;  %v523_v38 = vadd.f32 %v522_v36, %v521_v34 }
 0x1b8   : > { %524 = vadd.xlane.f32.xlu2 %v523_v38 }
 0x229   : > { %v513_v46 = vpop.xlane.xlu1 %512 }
 0x22a   : > { %v514_v47 = vrot.slane %v513_v46, 4 }
 0x22b   : > { %v525_v49 = vpop.xlane.xlu2 %524 }
 0x22c   : > { %v515_v50 = vadd.f32 %v514_v47, %v513_v46  ;;  %v526_v51 = vrot.slane %v525_v49, 4 }
 0x22e   : > { %v516_v52 = vrot.slane %v515_v50, 2  ;;  %v527_v53 = vadd.f32 %v526_v51, %v525_v49 }
 0x230   : > { %v528_v55 = vrot.slane %v527_v53, 2  ;;  %v517_v56 = vadd.f32 %v516_v52, %v515_v50 }
 0x232   : > { %v518_v57 = vrot.slane %v517_v56, 1  ;;  %v529_v58 = vadd.f32 %v528_v55, %v527_v53 }
 0x234   : > { %v519_v60 = vadd.f32 %v518_v57, %v517_v56  ;;  %v530_v61 = vrot.slane %v529_v58, 1 }
 0x236   : > { %1014 = vpush %v519_v60  ;;  %v531_v62 = vadd.f32 %v530_v61, %v529_v58 }
 0x238   : > { %1016 = vpush %v531_v62 }
 0x239   : > { %1018 = vpush %v539_v63 }
 0x267   : > { %s1015_s14 = spop %1014 }
 0x269   : > { %s1017_s15 = spop %1016 }
 0x26a   : > { %s1431_s16 = spop %1018 }
 0x26b   : > { %s541_s17 = smul.f32 %s1431_s16, %s1015_s14 }
 0x26c   : > { %s550_s13 = smul.f32 %s1431_s16, %s1017_s15 }
 0x26d   : > { %s551_s9 = smul.f32 %s541_s17, %s541_s17  ;;  %v566_v11 = vstv %s541_s17 }
 0x26e   : > { %v567_v12 = vsub.f32 %v1415_v33, %v566_v11  ;;  %v568_v13 = vsub.f32 %v1419_v35, %v566_v11 }
 0x26f   : > { %s552_s23 = ssub.f32 %s550_s13, %s551_s9 }
 0x271   : > { %s553_s21 = sadd.f32 1e-05, %s552_s23 }
 0x273   : > { %v554_v0 = vstv %s553_s21  ;;  %s1613_s21 = smov 127  }
 0x274   : > { %1132 = vrsqrt.f32 %v554_v0  ;;  %vm561_vm14 = vweird.f32 %v554_v0 }
 0x27a   : > { %v1133_v1 = vpop.eup %1132 }
 0x27b   : > { %v556_v2 = vmul.f32 %v1133_v1, %v554_v0  ;;  %vm562_vm3 = vweird.f32 %v1133_v1 }
 0x27c   : > { %vm563_vm15 = vmor %vm561_vm14, %vm562_vm3 }
 0x27d   : > { %v557_v3 = vmul.f32 %v1133_v1, %v556_v2 }
 0x27f   : > { %v558_v5 = vmul.f32 0.5, %v557_v3 }
 0x281   : > { %v559_v7 = vsub.f32 1.5, %v558_v5 }
 0x283   : > { %v560_v8 = vmul.f32 %v1133_v1, %v559_v7 }
 0x285   : > { %v564_v9 = vsel %vm563_vm15, %v1133_v1, %v560_v8 }
 0x286   : > { %1020 = vpush %v564_v9 }
 0x2b7   : > { %s1021_s14 = spop %1020 }
 0x2b8   : > { %v569_v14 = vstv %s1021_s14 }
 0x2b9   : > { %v570_v15 = vmul.f32 %v569_v14, %v567_v12  ;;  %v571_v16 = vmul.f32 %v569_v14, %v568_v13 }
 0x2bb   : > { %v577_v17 = vmul.f32 %v575_v10, %v570_v15  ;;  %v578_v18 = vmul.f32 %v575_v10, %v571_v16 }
 0x2bd   : > { %v1437_v20 = vadd.f32 %v582_v19, %v577_v17  ;;  %v1439_v22 = vadd.f32 %v582_v19, %v578_v18 }
 0x2bf   : > { %v1442_v23 = vmul.f32 0.70710677, %v1437_v20  ;;  %v1445_v24 = vmul.f32 0.70710677, %v1439_v22 }
 0x2c1   : > { %v590_v26 = vmul.f32 %v1442_v23, %v1442_v23  ;;  %v630_v27 = vmul.f32 %v1445_v24, %v1445_v24 }
 0x2c3   : > { %v591_v28 = vmin.f32 %v590_v26, 16.0  ;;  %v631_v29 = vmin.f32 %v630_v27, 16.0 }
 0x2c5   : > { %v592_v30 = vmul.f32 2.1237322e-06, %v591_v28  ;;  %v603_v31 = vmul.f32 3.8918573e-05, %v591_v28  ;;  %v632_v4 = vmul.f32 2.1237322e-06, %v631_v29 }
 0x2c6   : > { %v643_v32 = vmul.f32 3.8918573e-05, %v631_v29 }
 0x2c7   : > { %v593_v33 = vadd.f32 0.00028619796, %v592_v30  ;;  %v604_v34 = vadd.f32 0.001143296, %v603_v31  ;;  %v633_v35 = vadd.f32 0.00028619796, %v632_v4 }
 0x2c8   : > { %v644_v36 = vadd.f32 0.001143296, %v643_v32 }
 0x2c9   : > { %v594_v37 = vmul.f32 %v593_v33, %v591_v28  ;;  %v605_v38 = vmul.f32 %v604_v34, %v591_v28  ;;  %v634_v6 = vmul.f32 %v633_v35, %v631_v29 }
 0x2ca   : > { %v645_v39 = vmul.f32 %v644_v36, %v631_v29 }
 0x2cb   : > { %v595_v40 = vadd.f32 0.0036580483, %v594_v37  ;;  %v606_v41 = vadd.f32 0.014752088, %v605_v38  ;;  %v635_v46 = vadd.f32 0.0036580483, %v634_v6 }
 0x2cc   : > { %v646_v42 = vadd.f32 0.014752088, %v645_v39  ;;  %v586_v38 = vmul.f32 0.5, %v1437_v20 }
 0x2cd   : > { %v607_v44 = vmul.f32 %v606_v41, %v591_v28  ;;  %v596_v48 = vmul.f32 %v595_v40, %v591_v28  ;;  %v636_v52 = vmul.f32 %v635_v46, %v631_v29  ;;  %v587_v41 = vmul.f32 0.5, %v1439_v22 }
 0x2ce   : > { %v647_v47 = vmul.f32 %v646_v42, %v631_v29 }
 0x2cf   : > { %v608_v49 = vadd.f32 0.112945676, %v607_v44  ;;  %v597_v54 = vadd.f32 0.05243302, %v596_v48  ;;  %v637_v58 = vadd.f32 0.05243302, %v636_v52 }
 0x2d0   : > { %v648_v50 = vadd.f32 0.112945676, %v647_v47 }
 0x2d1   : > { %v609_v51 = vmul.f32 %v608_v49, %v591_v28  ;;  %v598_v60 = vmul.f32 %v597_v54, %v591_v28  ;;  %v638_v63 = vmul.f32 %v637_v58, %v631_v29 }
 0x2d2   : > { %v649_v53 = vmul.f32 %v648_v50, %v631_v29 }
 0x2d3   : > { %v610_v55 = vadd.f32 0.4994258, %v609_v51  ;;  %v599_v0 = vadd.f32 0.18741608, %v598_v60  ;;  %v639_v1 = vadd.f32 0.18741608, %v638_v63 }
 0x2d4   : > { %v650_v56 = vadd.f32 0.4994258, %v649_v53 }
 0x2d5   : > { %v611_v57 = vmul.f32 %v610_v55, %v591_v28  ;;  %v600_v3 = vmul.f32 %v599_v0, %v591_v28  ;;  %v640_v10 = vmul.f32 %v639_v1, %v631_v29 }
 0x2d6   : > { %v651_v59 = vmul.f32 %v650_v56, %v631_v29 }
 0x2d7   : > { %v612_v61 = vadd.f32 1.0, %v611_v57  ;;  %v601_v11 = vadd.f32 1.1283791, %v600_v3  ;;  %v641_v26 = vadd.f32 1.1283791, %v640_v10 }
 0x2d8   : > { %v652_v62 = vadd.f32 1.0, %v651_v59 }
 0x2d9   : > { %1134 = vrcp.f32 %v612_v61  ;;  %v624_v12 = vand.u32 2147483648, %v612_v61  ;;  %v622_v15 = vand.u32 2147483647, %v612_v61  ;;  %vm618_vm15 = vweird.f32 %v612_v61 }
 0x2da   : > { %1136 = vrcp.f32 %v652_v62  ;;  %v664_v16 = vand.u32 2147483648, %v652_v62  ;;  %v662_v18 = vand.u32 2147483647, %v652_v62  ;;  %vm658_vm11 = vweird.f32 %v652_v62 }
 0x2db   : > { %v625_v27 = vor.u32 1.1754944e-38, %v624_v12  ;;  %v602_v30 = vmul.f32 %v601_v11, %v1442_v23  ;;  %vm623_vm6 = vcmp.eq.f32.partialorder %v622_v15, 8.507059e+37  ;;  %v642_v34 = vmul.f32 %v641_v26, %v1445_v24 }
 0x2dc   : > { %v665_v31 = vor.u32 1.1754944e-38, %v664_v16  ;;  %vm663_vm5 = vcmp.eq.f32.partialorder %v662_v18, 8.507059e+37 }
 0x2df   : > { %v1135_v2 = vpop.eup %1134 }
 0x2e0   : > { %v1137_v5 = vpop.eup %1136  ;;  %v614_v7 = vmul.f32 %v1135_v2, %v612_v61  ;;  %vm619_vm3 = vweird.f32 %v1135_v2 }
 0x2e1   : > { %v654_v8 = vmul.f32 %v1137_v5, %v652_v62  ;;  %vm659_vm14 = vweird.f32 %v1137_v5  ;;  %vm620_vm13 = vmor %vm618_vm15, %vm619_vm3 }
 0x2e2   : > { %v615_v9 = vsub.f32 1.0, %v614_v7  ;;  %vm660_vm10 = vmor %vm658_vm11, %vm659_vm14  ;;  %vm1620_vm11 = vcmask 1031168  }
 0x2e3   : > { %v655_v13 = vsub.f32 1.0, %v654_v8 }
 0x2e4   : > { %v616_v14 = vmul.f32 %v1135_v2, %v615_v9 }
 0x2e5   : > { %v656_v17 = vmul.f32 %v1137_v5, %v655_v13 }
 0x2e6   : > { %v617_v19 = vadd.f32 %v1135_v2, %v616_v14 }
 0x2e7   : > { %v657_v28 = vadd.f32 %v1137_v5, %v656_v17 }
 0x2e8   : > { %v621_v29 = vsel %vm620_vm13, %v1135_v2, %v617_v19  ;;  %vm1622_vm13 = vcmask 1039360  }
 0x2e9   : > { %v626_v4 = vsel %vm623_vm6, %v625_v27, %v621_v29  ;;  %v661_v32 = vsel %vm660_vm10, %v1137_v5, %v657_v28  ;;  %vm1618_vm10 = vcmask 916480   ;;  %vm1623_vm3 = vmmov %vm1622_vm13 }
 0x2ea   : > { %v627_v33 = vmul.f32 %v626_v4, %v602_v30  ;;  %v666_v35 = vsel %vm663_vm5, %v665_v31, %v661_v32 }
 0x2eb   : > { %v667_v37 = vmul.f32 %v666_v35, %v642_v34 }
 0x2ec   : > { %v991_v36 = vclamps-f32 %v627_v33, 1.0 }
 0x2ed   : > { %v992_v40 = vclamps-f32 %v667_v37, 1.0 }
 0x2ee   : > { %v670_v6 = vadd.f32 1.0, %v991_v36 }
 0x2ef   : > { %v671_v23 = vadd.f32 1.0, %v992_v40 }
 0x2f0   : > { %v672_v39 = vmul.f32 %v670_v6, %v586_v38  ;;  %v825_v6 = vld [vmem:[%s1587_s5] sm:$0xff] }
 0x2f1   : > { %v673_v42 = vmul.f32 %v671_v23, %v587_v41 }
 0x2f2   : > { %676 = vrot.lane.b32.xlu0 %v672_v39, %s1204_s18 }
 0x2fa   : > { %678 = vrot.lane.b32.xlu0 %v673_v42, %s1204_s18  ;;  %s1611_s18 = smov 112  }
 0x364   : > { %v677_v44 = vpop.permute.xlu0 %676 }
 0x365   : > { %v1458_v46 = vsel %vm317_vm0, 0.0, %v677_v44 }
 0x366   : > { %738 = vrot.lane.b32.xlu2 %v1458_v46, %s1205_s19 }
 0x36c   : > { %v679_v24 = vpop.permute.xlu0 %678 }
 0x36d   : > { %v1463_v20 = vsel %vm317_vm0, %v677_v44, %v679_v24  ;;  %v685_v47 = vsel %vm317_vm0, %v679_v24, 0.0  ;;  %vm1614_vm0 = vcmask 900096  }
 0x36e   : > { %726 = vrot.lane.b32.xlu2 %v1458_v46, %s1208_s22  ;;  %742 = vrot.lane.b32.xlu0 %v685_v47, %s1205_s19  ;;  %v1114_v22 = vpack.i.bf16 %v1463_v20, %v1458_v46  ;;  %vm1616_vm5 = vmmov %vm1614_vm0 }
 0x36f   : > { %740 = vrot.lane.b32.xlu1 %v1463_v20, %s1205_s19  ;;  %s1612_s19 = smov 126  }
 0x376   : > { %714 = vrot.lane.b32.xlu2 %v1458_v46, %s1206_s20  ;;  %1115 = vrot.lane.b32.xlu0 %v1114_v22, %s1211_s8 }
 0x377   : > { %728 = vrot.lane.b32.xlu1 %v1463_v20, %s1208_s22 }
 0x37e   : > { %1120 = vrot.lane.b32.xlu2 %v1114_v22, %s1210_s29  ;;  %774 = vrot.lane.b32.xlu0 %v685_v47, %s1211_s8 }
 0x37f   : > { %716 = vrot.lane.b32.xlu1 %v1463_v20, %s1206_s20 }
 0x386   : > { %704 = vrot.lane.b32.xlu2 %v1463_v20, %s1611_s18  ;;  %730 = vrot.lane.b32.xlu0 %v685_v47, %s1208_s22  ;;  %s1013_s22 = sshll.u32 %s1276_s28, 4 }
 0x387   : > { %764 = vrot.lane.b32.xlu1 %v685_v47, %s1210_s29  ;;  %s916_s9 = scalar_lea.hbm %s1589_s7, %s1013_s22 }
 0x38e   : > { %692 = vrot.lane.b32.xlu2 %v1463_v20, %s1612_s19  ;;  %718 = vrot.lane.b32.xlu0 %v685_v47, %s1206_s20  ;;  %s269_s20 = sand.u32 1, %s1194_s25  }
 0x38f   : > { %706 = vrot.lane.b32.xlu1 %v685_v47, %s1611_s18  ;;  %s905_s28 = scalar_lea.sflag [#allocation3], %s269_s20 }
 0x396   : > { %754 = vrot.lane.b32.xlu2 %v685_v47, %s1613_s21  ;;  %702 = vrot.lane.b32.xlu0 %v1458_v46, %s1611_s18 }
 0x397   : > { %694 = vrot.lane.b32.xlu1 %v685_v47, %s1612_s19 }
 0x39e   : > { %690 = vrot.lane.b32.xlu0 %v1458_v46, %s1612_s19  ;;  %890 = vperm.xlu2 %1129, %v825_v6  }
 0x3a6   : > { %1125 = vrot.lane.b32.xlu0 %v1114_v22, %s1613_s21  ;;  %897 = vperm.xlu2 %1129, %v826_v43  }
 0x3c0   : > { %v739_v48 = vpop.permute.xlu2 %738 }
 0x3c8   : > { %v727_v49 = vpop.permute.xlu2 %726 }
 0x3d0   : > { %v715_v54 = vpop.permute.xlu2 %714 }
 0x3d8   : > { %v1121_v60 = vpop.permute.xlu2 %1120 }
 0x3d9   : > { %v1123_v62 = vunpack.i.h.bf16 %v1121_v60  ;;  %v1122_v63 = vunpack.i.l.bf16 %v1121_v60 }
 0x3e0   : > { %v743_v50 = vpop.permute.xlu0 %742  ;;  %v705_v10 = vpop.permute.xlu2 %704 }
 0x3e1   : > { %v741_v51 = vpop.permute.xlu1 %740 }
 0x3e2   : > { %v744_v52 = vsel %vm394_vm1, %v739_v48, %v741_v51  ;;  %v745_v53 = vsel %vm394_vm1, %v741_v51, %v743_v50  ;;  %vm1615_vm1 = vcmask 908288  }
 0x3e3   : > { %993 = vmatpush.msk.msra.mxu2 %vm1344_vm4, %v744_v52  ;;  %1000 = vmatpush.msk.msra.mxu3 %vm1340_vm2, %v745_v53  ;;  %v766_v5 = vsel %vm1615_vm1, %v1122_v63, %v1123_v62  ;;  %vm1617_vm6 = vmmov %vm1615_vm1 }
 0x3e8   : > { %v1116_v55 = vpop.permute.xlu0 %1115  ;;  %v693_v17 = vpop.permute.xlu2 %692 }
 0x3e9   : > { %v1118_v56 = vunpack.i.h.bf16 %v1116_v55  ;;  %v1117_v57 = vunpack.i.l.bf16 %v1116_v55  ;;  %v729_v58 = vpop.permute.xlu1 %728 }
 0x3ea   : > { %v732_v61 = vsel %vm381_vm7, %v727_v49, %v729_v58 }
 0x3eb   : > { %v776_v59 = vsel %vm444_vm12, %v1117_v57, %v1118_v56 }
 0x3ec   : > { %793 = vmatpush.msra.mxu2 %v776_v59 }
 0x3ee   : > { %994 = vmatpush.msk.msra.mxu2 %vm1359_vm8, %v732_v61 }
 0x3f0   : > { %v775_v0 = vpop.permute.xlu0 %774  ;;  %v755_v4 = vpop.permute.xlu2 %754 }
 0x3f1   : > { %v717_v1 = vpop.permute.xlu1 %716  ;;  %v777_v2 = vsel %vm444_vm12, %v1118_v56, %v775_v0  ;;  %vm1621_vm12 = vmmov %vm1620_vm11 }
 0x3f2   : > { %v720_v3 = vsel %vm1614_vm0, %v715_v54, %v717_v1  ;;  %813 = vmatpush.msra.mxu3 %v777_v2 }
 0x3f3   : > { %995 = vmatpush.msk.msra.mxu2 %vm1344_vm4, %v720_v3 }
 0x3f5   : > { %796 = vmatpush.msra.mxu2 %v766_v5 }
 0x3f8   : > { %v731_v7 = vpop.permute.xlu0 %730 }
 0x3f9   : > { %v765_v8 = vpop.permute.xlu1 %764  ;;  %v733_v9 = vsel %vm381_vm7, %v729_v58, %v731_v7  ;;  %vm1619_vm7 = vmmov %vm1618_vm10  ;;  %v891_v58 = vpop.permute.xlu2 %890 }
 0x3fa   : > { %1001 = vmatpush.msk.msra.mxu3 %vm1364_vm9, %v733_v9  ;;  %v767_v14 = vsel %vm1617_vm6, %v1123_v62, %v765_v8 }
 0x400   : > { %v719_v11 = vpop.permute.xlu0 %718 }
 0x401   : > { %v707_v12 = vpop.permute.xlu1 %706  ;;  %v721_v13 = vsel %vm1616_vm5, %v717_v1, %v719_v11  ;;  %v898_v3 = vpop.permute.xlu2 %897 }
 0x402   : > { %1002 = vmatpush.msk.msra.mxu3 %vm1340_vm2, %v721_v13  ;;  %v709_v15 = vsel %vm1618_vm10, %v705_v10, %v707_v12 }
 0x404   : > { %816 = vmatpush.msra.mxu3 %v767_v14 }
 0x406   : > { %1003 = vmatpush.msk.msra.mxu3 %vm1364_vm9, %v709_v15 }
 0x408   : > { %v703_v16 = vpop.permute.xlu0 %702 }
 0x409   : > { %v695_v18 = vpop.permute.xlu1 %694  ;;  %v708_v19 = vsel %vm1619_vm7, %v703_v16, %v705_v10 }
 0x40a   : > { %996 = vmatpush.msk.msra.mxu2 %vm1359_vm8, %v708_v19  ;;  %v697_v26 = vsel %vm1620_vm11, %v693_v17, %v695_v18 }
 0x40b   : > { %1004 = vmatpush.msk.msra.mxu3 %vm1340_vm2, %v697_v26  ;;  %vm781_vm2 = vcmask 588800  }
 0x410   : > { %v691_v27 = vpop.permute.xlu0 %690 }
 0x411   : > { %v696_v28 = vsel %vm1621_vm12, %v691_v27, %v693_v17 }
 0x412   : > { %997 = vmatpush.msk.msra.mxu2 %vm1344_vm4, %v696_v28 }
 0x418   : > { %v1126_v30 = vpop.permute.xlu0 %1125 }
 0x419   : > { %v1128_v29 = vunpack.i.h.bf16 %v1126_v30  ;;  %v1127_v31 = vunpack.i.l.bf16 %v1126_v30 }
 0x41b   : > { %v756_v32 = vsel %vm1622_vm13, %v1127_v31, %v1128_v29  ;;  %v757_v33 = vsel %vm1623_vm3, %v1128_v29, %v755_v4 }
 0x41c   : > { %799 = vmatpush.msra.mxu2 %v756_v32  ;;  %819 = vmatpush.msra.mxu3 %v757_v33 }
 0x41e   : > { %998 = vmatpush.msk.msra.mxu2 %vm1359_vm8, %v1458_v46  ;;  %1005 = vmatpush.msk.msra.mxu3 %vm1364_vm9, %v1463_v20 }
 0x41f   : > { %999 = vmatmul.msk.f32.vlgmr.msra.gmra.mxu2 %vm781_vm2, %v780_v21  ;;  %1006 = vmatmul.msk.f32.vlgmr.msra.gmra.mxu3 %vm781_vm2, %v780_v21 }
 0x4a2   : > { %v802_v25 = vpop.f32.mrf.mxu2  ;;  %v822_v34 = vpop.f32.mrf.mxu3 }
 0x4a3   : > { %v837_v35 = vmul.f32 %v802_v25, %v802_v25  ;;  %v838_v36 = vmul.f32 %v822_v34, %v822_v34  ;;  %v827_v37 = vadd.f32 %v822_v34, %v802_v25 }
 0x4a5   : > { %828 = vadd.xlane.f32.xlu1 %v827_v37  ;;  %v839_v38 = vadd.f32 %v838_v36, %v837_v35 }
 0x4a7   : > { %840 = vadd.xlane.f32.xlu0 %v839_v38 }
 0x518   : > { %v829_v45 = vpop.xlane.xlu1 %828 }
 0x519   : > { %v830_v39 = vrot.slane %v829_v45, 4 }
 0x51a   : > { %v841_v40 = vpop.xlane.xlu0 %840 }
 0x51b   : > { %v831_v23 = vadd.f32 %v830_v39, %v829_v45  ;;  %v842_v41 = vrot.slane %v841_v40, 4 }
 0x51d   : > { %v832_v42 = vrot.slane %v831_v23, 2  ;;  %v843_v44 = vadd.f32 %v842_v41, %v841_v40 }
 0x51f   : > { %v833_v46 = vadd.f32 %v832_v42, %v831_v23  ;;  %v844_v24 = vrot.slane %v843_v44, 2 }
 0x521   : > { %v845_v20 = vadd.f32 %v844_v24, %v843_v44  ;;  %v834_v47 = vrot.slane %v833_v46, 1 }
 0x523   : > { %v835_v22 = vadd.f32 %v834_v47, %v833_v46  ;;  %v846_v48 = vrot.slane %v845_v20, 1 }
 0x525   : > { %1022 = vpush %v835_v22  ;;  %v847_v49 = vadd.f32 %v846_v48, %v845_v20 }
 0x527   : > { %1024 = vpush %v847_v49 }
 0x556   : > { %s1023_s15 = spop %1022 }
 0x557   : > { %s857_s17 = smul.f32 %s1023_s15, %s1431_s16 }
 0x558   : > { %s1025_s13 = spop %1024 }
 0x559   : > { %s867_s14 = smul.f32 %s857_s17, %s857_s17  ;;  %v882_v59 = vstv %s857_s17 }
 0x55a   : > { %s866_s18 = smul.f32 %s1025_s13, %s1431_s16  ;;  %s984_s16 = sshll.u32 %s269_s20, 4  ;;  %v883_v60 = vsub.f32 %v802_v25, %v882_v59  ;;  %v884_v61 = vsub.f32 %v822_v34, %v882_v59 }
 0x55b   : > { %s271_s15 = scalar_lea.vmem [#allocation2], %s984_s16  ;;  %s1160_s16 = scalar_lea.hbm %s1589_s7, 32 }
 0x55c   : > { %s868_s19 = ssub.f32 %s866_s18, %s867_s14  ;;  %s918_s13 = sshll.u32 %s271_s15, 4  ;;  %s919_s13 = int_to_ptr.vmem [resolvable:$true] %s918_s13 }
 0x55d   : > { %s920_s14 = sshll.u32 %s916_s9, 4  ;;  %s921_s14 = int_to_ptr.hbm [resolvable:$true] %s920_s14 }
 0x55e   : > { %s869_s21 = sadd.f32 1e-05, %s868_s19  ;;  %s1154_s17 = sshra.s32 %s921_s14, 4  ;;  %s1155_s17 = int_to_ptr.hbm [resolvable:$true] %s1154_s17 }
 0x55f   : > { %s1156_s18 = scalar_lea.hbm %s1155_s17, 16  ;;  %p1161_p0 = scmp.lt.s32.totalorder %s1155_s17, %s1589_s7 }
 0x560   : > { %v870_v50 = vstv %s869_s21  ;;  %p1157_p11 = scmp.ne.s32.totalorder %s1155_s17, %s1156_s18  ;;  %p1162_p1 = scmp.lt.s32.totalorder %s1160_s16, %s1156_s18 }
 0x561   : > { %1138 = vrsqrt.f32 %v870_v50  ;;  %vm877_vm8 = vweird.f32 %v870_v50 }
 0x562   : > { %p1158_p12 = pnand %p1157_p11, %p1293_p5  ;;  %p1163_p2 = por %p1162_p1, %p1161_p0 }
 0x564   : > { %p1159_p13 = pneg %p1158_p12 }
 0x566   : > { %p1164_p3 = pnand %p1163_p2, %p1159_p13 }
 0x567   : > { %v1139_v51 = vpop.eup %1138 }
 0x568   : > { %v872_v52 = vmul.f32 %v1139_v51, %v870_v50  ;;  %vm878_vm4 = vweird.f32 %v1139_v51 }
 0x569   : > { %vm879_vm9 = vmor %vm877_vm8, %vm878_vm4 }
 0x56a   : > { %v873_v53 = vmul.f32 %v1139_v51, %v872_v52 }
 0x56c   : > { %v874_v54 = vmul.f32 0.5, %v873_v53 }
 0x56e   : > { %v875_v55 = vsub.f32 1.5, %v874_v54 }
 0x570   : > { %v876_v56 = vmul.f32 %v1139_v51, %v875_v55 }
 0x572   : > { %v880_v57 = vsel %vm879_vm9, %v1139_v51, %v876_v56 }
 0x573   : > { %1026 = vpush %v880_v57 }
 0x5a4   : > { %s1027_s23 = spop %1026 }
 0x5a5   : > { %v885_v62 = vstv %s1027_s23 }
 0x5a6   : > { %v886_v63 = vmul.f32 %v885_v62, %v883_v60  ;;  %v887_v0 = vmul.f32 %v885_v62, %v884_v61 }
 0x5a8   : > { %v893_v1 = vmul.f32 %v891_v58, %v886_v63  ;;  %v894_v2 = vmul.f32 %v891_v58, %v887_v0 }
 0x5aa   : > { %v900_v5 = vadd.f32 %v898_v3, %v893_v1  ;;  %v901_v7 = vadd.f32 %v898_v3, %v894_v2 }
 0x5ac   : > { %902 = vst [vmem:[%s271_s15] sm:$0xff] %v900_v5 }
 0x5ad   : > { %903 = vst [vmem:[%s271_s15 + $0x8] sm:$0xff] %v901_v7 }
 0x5ae   : > { %1167 = shalt.err (!%p1164_p3)
}
 0x5af   : > { %1028 = dma.vmem_to_hbm [thread:$0]  (%p1293_p5), %s919_s13, 256, %s921_s14, %s905_s28  }
 0x5b0 PF: > { %p1034_p4 = scmp.ge.s32.totalorder %s1202_s27, 2  ;;  %s932_s20 = sand.u32 1, %s1190_s24  }
 0x5b1   : > { %s933_s29 = scalar_lea.sflag [#allocation3], %s932_s20 }
 0x5b2   : > { %p1031_p7 = pnand %p1034_p4, %p1297_p6 }
 0x5b4   : > { %p1032_p8 = pneg %p1031_p7 }
 0x5b6   : > { %1185 = dma.done.wait (%p1032_p8), %s933_s29, 256  }
 0x5b7   : > { %1187 = vsyncadd (%p1032_p8), %s933_s29, 4294967040  ;;  %p17_p9 = scmp.ge.s32.totalorder %s1280_s30, 4   ;;  %s1624_s24 = smov %s1194_s25 }
 0x5b8   : > { %s1625_s25 = smov %s1198_s26  ;;  %s1626_s26 = smov %s1291_s10 }
 0x5b9   : > { %s1627_s27 = smov %s1280_s30  ;;  %19 = sbr.rel (!%p17_p9) target bundleno = 3 (0x3), region = 83 }
 0x5be   :  { %939 = vsyncpa [#allocation3], 1 }
 0x5bf   :  { %941 = vsyncpa [#allocation3 + $0x1], 1 }

</bundles_post_ra>
